<compile_context>
chip_gen: v7x
topology: tpu7x:2x2x1
jax: 0.10.0
libtpu: 0.0.40
codegen_flags: <defaults>
</compile_context>

<pallas_src>
import functools

import jax
import jax.numpy as jnp
from jax.experimental import pallas as pl
from jax.experimental.pallas import tpu as pltpu

LANE = 128


def _round_up(n, m):
    return ((n + m - 1) // m) * m


def dann_kernel(x_ref, w1_ref, b1_ref, w23_ref, b23_ref, out_ref):
    # Feature extractor: Linear + Sigmoid (bf16 operands, f32 MXU accumulate).
    h = jnp.dot(x_ref[...], w1_ref[...],
                preferred_element_type=jnp.float32) + b1_ref[...]
    # sigmoid(h) = 1 / (1 + exp(-h)); exp and approx-reciprocal both run on the
    # EUP slot, keeping the VALU free.  Kept in f32 (v5e has no bf16 EUP path).
    features = pl.reciprocal(1.0 + jnp.exp(-h), approx=True)

    # Fused heads: [label_predictor | domain_predictor] in one lane-dense
    # matmul + one lane-dense bf16 store.  GRL forward == identity, so the
    # domain head sees the same features.
    # TODO(synk): GRL (gradient reversal) only affects backward (grad * -alpha);
    # there is no forward op to translate.
    out = jnp.dot(features.astype(jnp.bfloat16), w23_ref[...],
                  preferred_element_type=jnp.float32) + b23_ref[...]
    out_ref[...] = out.astype(out_ref.dtype)


def prepare_dann_params(w1, b1, w2, b2, w3, b3):
    """One-time weight preprocessing (hoisted out of the per-call forward path).

    Fuses the two heads into W2||W3, pads the fused head dim to 128 lanes
    (lane-dense output store), casts matmul operands to bf16, and keeps biases
    in f32.  Weights are (in_features, out_features), i.e. transposed vs
    PyTorch, so the kernel computes plain x @ W + b.
    """
    H, C = w2.shape
    Cp = _round_up(C + 1, LANE)

    w23 = jnp.concatenate([w2, w3], axis=1)                      # (H, C+1)
    b23 = jnp.concatenate([b2, b3], axis=0)                      # (C+1,)

    w1b = w1.astype(jnp.bfloat16)                                # (D, H)
    b1b = b1.astype(jnp.float32).reshape(1, H)                   # (1, H)
    w23p = jnp.zeros((H, Cp), jnp.bfloat16).at[:, :C + 1].set(
        w23.astype(jnp.bfloat16))                                # (H, Cp)
    b23p = jnp.zeros((1, Cp), jnp.float32).at[0, :C + 1].set(
        b23.astype(jnp.float32))                                 # (1, Cp)
    return w1b, b1b, w23p, b23p


def dann_forward(x, w1, b1, w23, b23, *, num_classes, alpha=1.0,
                 block_b=1024, vmem_limit_bytes=32 * 1024 * 1024):
    """Pallas-backed DANN forward.

    `w1/b1/w23/b23` must come from `prepare_dann_params` (already fused,
    padded and cast).  `alpha` only matters for the backward GRL pass and is
    unused in the forward.  Returns (label_output, domain_output) in f32.

    Note: vmem_limit_bytes=32MiB is the v7x-safe default; on v5e/v6e (128 MiB
    physical VMEM) it can be raised to 64-96 MiB if weights/tiles grow.
    """
    del alpha  # forward is independent of alpha
    B, D = x.shape
    H = w1.shape[1]
    Cp = w23.shape[1]

    # ---- near-even batch tiling: waste bounded by one 16-row group/tile ----
    Bp0 = _round_up(B, 16)                    # bf16 sublane packing = 16
    n_tiles = -(-Bp0 // block_b)              # ceil
    TB = _round_up(-(-Bp0 // n_tiles), 16)    # near-even tile, 16-aligned
    Bp = TB * n_tiles

    xb = x.astype(jnp.bfloat16)
    if Bp != B:
        xb = jnp.pad(xb, ((0, Bp - B), (0, 0)))

    # Resident operands: block index never changes -> single buffer.
    resident = dict(pipeline_mode=pl.Buffered(1))

    out = pl.pallas_call(
        dann_kernel,
        # bf16 output: halves the dominant HBM writeback stream; f32 accum
        # stays inside the kernel.
        out_shape=jax.ShapeDtypeStruct((Bp, Cp), jnp.bfloat16),
        grid_spec=pltpu.PrefetchScalarGridSpec(
            num_scalar_prefetch=0,
            grid=(n_tiles,),
            in_specs=[
                # x tile: pipelined (double-buffered) along the batch grid.
                pl.BlockSpec((TB, D), lambda i: (i, 0)),
                # Weights / biases: resident in VMEM across all grid steps.
                pl.BlockSpec((D, H), lambda i: (0, 0), **resident),   # W1
                pl.BlockSpec((1, H), lambda i: (0, 0), **resident),   # b1
                pl.BlockSpec((H, Cp), lambda i: (0, 0), **resident),  # W2||W3
                pl.BlockSpec((1, Cp), lambda i: (0, 0), **resident),  # b2||b3
            ],
            out_specs=pl.BlockSpec((TB, Cp), lambda i: (i, 0)),
        ),
        compiler_params=pltpu.CompilerParams(
            dimension_semantics=("parallel",),   # megacore-shard the batch axis
            vmem_limit_bytes=vmem_limit_bytes,
        ),
    )(xb, w1, b1, w23, b23)

    # TODO(synk): for very small heads (C+1 <= 8), measure a narrow (masked-vst)
    # output layout vs this lane-dense one; it writes ~16-25x fewer HBM bytes.

    # Split the fused, padded output outside the kernel (tiny slices).
    label_out = out[:B, :num_classes].astype(jnp.float32)
    domain_out = out[:B, num_classes:num_classes + 1].astype(jnp.float32)
    return label_out, domain_out


def init_params(key, input_dim, hidden_dim, num_classes):
    """Deterministic init mimicking PyTorch nn.Linear default (uniform ±1/sqrt(fan_in))."""
    k1, k2, k3, k4, k5, k6 = jax.random.split(key, 6)

    def u(k, shape, fan_in):
        bound = 1.0 / jnp.sqrt(fan_in)
        return jax.random.uniform(k, shape, jnp.float32, -bound, bound)

    w1 = u(k1, (input_dim, hidden_dim), input_dim)
    b1 = u(k2, (hidden_dim,), input_dim)
    w2 = u(k3, (hidden_dim, num_classes), hidden_dim)
    b2 = u(k4, (num_classes,), hidden_dim)
    w3 = u(k5, (hidden_dim, 1), hidden_dim)
    b3 = u(k6, (1,), hidden_dim)
    return w1, b1, w2, b2, w3, b3


if __name__ == "__main__":
    batch = 8
    input_dim = 16
    hidden_dim = 32
    num_classes = 4

    key = jax.random.PRNGKey(0)
    kx, kp = jax.random.split(key)
    x = jax.random.normal(kx, (batch, input_dim), jnp.float32)
    params = init_params(kp, input_dim, hidden_dim, num_classes)

    # One-time weight preprocessing, then a jitted forward over (x, prepped).
    prepped = prepare_dann_params(*params)
    fwd = jax.jit(functools.partial(dann_forward, num_classes=num_classes))

    label_out, domain_out = fwd(x, *prepped)
    jax.block_until_ready((label_out, domain_out))

    # Reference check in plain JAX (f32).  Tolerance loosened for bf16
    # operands + bf16 output + approx reciprocal in the sigmoid.
    w1, b1, w2, b2, w3, b3 = params
    feats = jax.nn.sigmoid(x @ w1 + b1)
    ref_label = feats @ w2 + b2
    ref_domain = feats @ w3 + b3
    assert label_out.shape == (batch, num_classes)
    assert domain_out.shape == (batch, 1)
    assert jnp.allclose(label_out, ref_label, atol=3e-2, rtol=3e-2)
    assert jnp.allclose(domain_out, ref_domain, atol=3e-2, rtol=3e-2)

    print("KERNEL_OK")
</pallas_src>

<mosaic_0001>
module attributes {stable_mosaic.version = 11 : i64} {
  func.func @dann_kernel(%arg0: i32, %arg1: memref<16x16xbf16, #tpu.memory_space<vmem>>, %arg2: memref<16x32xbf16, #tpu.memory_space<vmem>>, %arg3: memref<1x32xf32, #tpu.memory_space<vmem>>, %arg4: memref<32x128xbf16, #tpu.memory_space<vmem>>, %arg5: memref<1x128xf32, #tpu.memory_space<vmem>>, %arg6: memref<16x128xbf16, #tpu.memory_space<vmem>>) attributes {dimension_semantics = [#tpu.dimension_semantics<parallel>], iteration_bounds = array<i64: 1>, scalar_prefetch = 0 : i64, scratch_operands = 0 : i64, tpu.core_type = #tpu.core_type<tc>, window_params = [{transform_indices = @transform_0, window_bounds = array<i64: 16, 16>}, {pipeline_mode = #tpu.pipeline_mode<synchronous>, transform_indices = @transform_1, window_bounds = array<i64: 16, 32>}, {pipeline_mode = #tpu.pipeline_mode<synchronous>, transform_indices = @transform_2, window_bounds = array<i64: 1, 32>}, {pipeline_mode = #tpu.pipeline_mode<synchronous>, transform_indices = @transform_3, window_bounds = array<i64: 32, 128>}, {pipeline_mode = #tpu.pipeline_mode<synchronous>, transform_indices = @transform_4, window_bounds = array<i64: 1, 128>}, {transform_indices = @transform_5, window_bounds = array<i64: 16, 128>}]} {
    %c0 = arith.constant 0 : index
    %c0_0 = arith.constant 0 : index
    %0 = vector.load %arg1[%c0, %c0_0] : memref<16x16xbf16, #tpu.memory_space<vmem>>, vector<16x16xbf16>
    %c0_1 = arith.constant 0 : index
    %c0_2 = arith.constant 0 : index
    %1 = vector.load %arg2[%c0_1, %c0_2] : memref<16x32xbf16, #tpu.memory_space<vmem>>, vector<16x32xbf16>
    %cst = arith.constant dense<0.000000e+00> : vector<16x32xf32>
    %2 = tpu.matmul %0, %1, %cst {dimension_numbers = #tpu.dot_dimension_numbers<[1], [0], [0], [1], [0, 0, 1, 1], [], []>} : vector<16x16xbf16>, vector<16x32xbf16>, vector<16x32xf32> -> vector<16x32xf32>
    %c0_3 = arith.constant 0 : index
    %c0_4 = arith.constant 0 : index
    %3 = vector.load %arg3[%c0_3, %c0_4] : memref<1x32xf32, #tpu.memory_space<vmem>>, vector<1x32xf32>
    %4 = vector.broadcast %3 : vector<1x32xf32> to vector<16x32xf32>
    %5 = arith.addf %2, %4 : vector<16x32xf32>
    %cst_5 = arith.constant 0.000000e+00 : f32
    %6 = vector.broadcast %cst_5 : f32 to vector<16x32xf32>
    %7 = arith.subf %6, %5 : vector<16x32xf32>
    %8 = math.exp %7 : vector<16x32xf32>
    %cst_6 = arith.constant 1.000000e+00 : f32
    %9 = vector.broadcast %cst_6 : f32 to vector<16x32xf32>
    %10 = arith.addf %9, %8 : vector<16x32xf32>
    %11 = tpu.reciprocal %10 {approx = true} : vector<16x32xf32> -> vector<16x32xf32>
    %12 = arith.truncf %11 : vector<16x32xf32> to vector<16x32xbf16>
    %c0_7 = arith.constant 0 : index
    %c0_8 = arith.constant 0 : index
    %13 = vector.load %arg4[%c0_7, %c0_8] : memref<32x128xbf16, #tpu.memory_space<vmem>>, vector<32x128xbf16>
    %cst_9 = arith.constant dense<0.000000e+00> : vector<16x128xf32>
    %14 = tpu.matmul %12, %13, %cst_9 {dimension_numbers = #tpu.dot_dimension_numbers<[1], [0], [0], [1], [0, 0, 1, 1], [], []>} : vector<16x32xbf16>, vector<32x128xbf16>, vector<16x128xf32> -> vector<16x128xf32>
    %c0_10 = arith.constant 0 : index
    %c0_11 = arith.constant 0 : index
    %15 = vector.load %arg5[%c0_10, %c0_11] : memref<1x128xf32, #tpu.memory_space<vmem>>, vector<1x128xf32>
    %16 = vector.broadcast %15 : vector<1x128xf32> to vector<16x128xf32>
    %17 = arith.addf %14, %16 : vector<16x128xf32>
    %18 = arith.truncf %17 : vector<16x128xf32> to vector<16x128xbf16>
    %c0_12 = arith.constant 0 : index
    %c0_13 = arith.constant 0 : index
    %19 = vector.load %arg6[%c0_12, %c0_13] : memref<16x128xbf16, #tpu.memory_space<vmem>>, vector<16x128xbf16>
    tpu.vector_store %arg6[%c0_12, %c0_13], %18 {strides = array<i32>} : memref<16x128xbf16, #tpu.memory_space<vmem>>, vector<16x128xbf16>,
    return
  }
  func.func @transform_0(%arg0: i32) -> (i32, i32) {
    %c0_i32 = arith.constant 0 : i32
    %c0_i32_0 = arith.constant 0 : i32
    return %arg0, %c0_i32 : i32, i32
  }
  func.func @transform_1(%arg0: i32) -> (i32, i32) {
    %c0_i32 = arith.constant 0 : i32
    %c0_i32_0 = arith.constant 0 : i32
    %c0_i32_1 = arith.constant 0 : i32
    return %c0_i32, %c0_i32_0 : i32, i32
  }
  func.func @transform_2(%arg0: i32) -> (i32, i32) {
    %c0_i32 = arith.constant 0 : i32
    %c0_i32_0 = arith.constant 0 : i32
    %c0_i32_1 = arith.constant 0 : i32
    return %c0_i32, %c0_i32_0 : i32, i32
  }
  func.func @transform_3(%arg0: i32) -> (i32, i32) {
    %c0_i32 = arith.constant 0 : i32
    %c0_i32_0 = arith.constant 0 : i32
    %c0_i32_1 = arith.constant 0 : i32
    return %c0_i32, %c0_i32_0 : i32, i32
  }
  func.func @transform_4(%arg0: i32) -> (i32, i32) {
    %c0_i32 = arith.constant 0 : i32
    %c0_i32_0 = arith.constant 0 : i32
    %c0_i32_1 = arith.constant 0 : i32
    return %c0_i32, %c0_i32_0 : i32, i32
  }
  func.func @transform_5(%arg0: i32) -> (i32, i32) {
    %c0_i32 = arith.constant 0 : i32
    %c0_i32_0 = arith.constant 0 : i32
    return %arg0, %c0_i32 : i32, i32
  }
}

</mosaic_0001>

<bundles_post_ra>
// kernel: dann_forward.1
= control target key start
LH: loop header
LB: loop body
LE: loop exit
PB: predicated region body
PF: predicated region fallthrough
CT: control target
= control target key end

     0   :  { %v231_v0 = vmov 0.0   ;;  %vm232_vm0 = vmmov 0   ;;  %vm43_vm1 = vcmask 130048   ;;  %vm122_vm2 = vcmask 261120   ;;  %s284_s1 = inlined_call_operand.vmem [shape: bf16[16,32], index: 1, kind: input, shape index: {}]   ;;  %s285_s0 = inlined_call_operand.vmem [shape: bf16[16,16], index: 0, kind: input, shape index: {}]   ;;  %s286_s3 = inlined_call_operand.vmem [shape: bf16[32,128], index: 3, kind: input, shape index: {}]   ;;  %s287_s2 = inlined_call_operand.vmem [shape: f32[1,32], index: 2, kind: input, shape index: {}]   ;;  %s288_s4 = inlined_call_operand.vmem [shape: f32[1,128], index: 4, kind: input, shape index: {}]   ;;  %s289_s5 = inlined_call_operand.vmem [shape: bf16[16,128], index: 5, kind: output, shape index: {}]  }
   0x1   :  { %203 = vmatprep.subr.bf16.mxu0 %v231_v0  ;;  %v219_v1 = vld [vmem:[%s284_s1] sm:$0xff]   ;;  %205 = vmatprep.mubr.msk.bf16.mxu0 %vm232_vm0, %v231_v0  ;;  %v222_v4 = vld [vmem:[%s286_s3 + $0x8] sm:$0xff]  }
   0x2   :  { %v220_v2 = vld [vmem:[%s285_s0] sm:$0xff]   ;;  %209 = vmatprep.subr.bf16.mxu1 %v231_v0  ;;  %213 = vmatprep.mubr.msk.bf16.mxu1 %vm232_vm0, %v231_v0 }
   0x3   :  { %204 = vmatpush3.bf16.msra.mxu0 %v219_v1  ;;  %v221_v3 = vld [vmem:[%s286_s3] sm:$0xff]  }
   0x4   :  { %210 = vmatpush3.bf16.msra.mxu1 %v221_v3  ;;  %v181_v5 = vld [vmem:[%s287_s2] ss:$0 sm:$0xff] }
   0x5   :  { %211 = vmatprep.subr.bf16.mxu1 %v231_v0  ;;  %v185_v23 = vld [vmem:[%s288_s4] ss:$0 sm:$0xff] }
   0x6   :  { %206 = vmatmul.mubr.msk.bf16.vlgmr.msra.gmra.mrb[0].mxu0 %vm43_vm1, %v220_v2 }
   0x8   :  { %212 = vmatpush3.bf16.msra.mxu1 %v222_v4 }
  0xd9   :  { %v81_v6 = vpop.f32.mrb[0].mxu0 }
  0xda   :  { %v82_v7 = vadd.f32 %v181_v5, %v81_v6  ;;  %v207_v8 = vpop.f32.mrb[1].mxu0 }
  0xdb   :  { %v84_v9 = vpop.f32.mrb[2].mxu0 }
  0xdc   :  { %v88_v10 = vsub.f32 0.0, %v82_v7  ;;  %v85_v11 = vadd.f32 %v181_v5, %v84_v9  ;;  %v208_v12 = vpop.f32.mrb[3].mxu0 }
  0xde   :  { %v90_v13 = vmul.f32 1.442695, %v88_v10  ;;  %v89_v14 = vsub.f32 0.0, %v85_v11 }
  0xe0   :  { %223 = vpow2.f32 %v90_v13  ;;  %v92_v15 = vmul.f32 1.442695, %v89_v14 }
  0xe2   :  { %225 = vpow2.f32 %v92_v15 }
  0xea   :  { %v224_v16 = vpop.eup %223 }
  0xeb   :  { %v94_v17 = vadd.f32 1.0, %v224_v16 }
  0xec   :  { %v226_v18 = vpop.eup %225 }
  0xed   :  { %v95_v19 = vadd.f32 1.0, %v226_v18  ;;  %227 = vrcp.f32 %v94_v17 }
  0xef   :  { %229 = vrcp.f32 %v95_v19 }
  0xf7   :  { %v228_v20 = vpop.eup %227 }
  0xf9   :  { %v230_v21 = vpop.eup %229 }
  0xfa   :  { %v98_v22 = vpack.c.bf16 %v230_v21, %v228_v20 }
  0xfc   :  { %214 = vmatmul.mubr.msk.bf16.vlgmr.msra.gmra.mrb[0].mxu1 %vm122_vm2, %v98_v22 }
 0x1cf   :  { %v160_v24 = vpop.f32.mrb[0].mxu1 }
 0x1d0   :  { %v215_v25 = vpop.f32.mrb[1].mxu1  ;;  %v161_v27 = vadd.f32 %v185_v23, %v160_v24 }
 0x1d1   :  { %v163_v26 = vpop.f32.mrb[2].mxu1 }
 0x1d2   :  { %v164_v28 = vadd.f32 %v185_v23, %v163_v26  ;;  %v216_v29 = vpop.f32.mrb[3].mxu1 }
 0x1d4   :  { %v196_v30 = vpack.c.bf16 %v164_v28, %v161_v27 }
 0x1d6   :  { %197 = vst [vmem:[%s289_s5] sm:$0xff] %v196_v30  }

</bundles_post_ra>
